<compile_context>
chip_gen: v7x
topology: tpu7x:2x2x1
jax: 0.10.0
libtpu: 0.0.40
codegen_flags: <defaults>
</compile_context>

<pallas_src>
import functools

import jax
import jax.numpy as jnp
from jax.experimental import pallas as pl
from jax.experimental.pallas import tpu as pltpu  # noqa: F401  (TPU backend)

IN_F = 64
HID_F = 16
OUT_F = 3


def _fused_mlp_kernel(x_ref, wf_ref, b_ref, o_ref, *, relu_start, relu_end):
    # x_ref: [M, 64], wf_ref: [64, 3], b_ref: [1, 3], o_ref: [M, 3]
    o = jnp.dot(x_ref[...], wf_ref[...], preferred_element_type=jnp.float32)
    o = o + b_ref[...]
    # Static row range [relu_start, relu_end) corresponds to the z rows.
    row = jax.lax.broadcasted_iota(jnp.int32, o.shape, 0)
    in_relu = (row >= relu_start) & (row < relu_end)
    o_ref[...] = jnp.where(in_relu, jnp.maximum(o, 0.0), o).astype(o_ref.dtype)


def model_forward(x, y, z, w, params):
    """Matches Model.forward: linear_1(linear_0(a)) for a in (x,y,z,w), relu on z."""
    w0, w1, b1 = params          # PyTorch layout: w0 [16,64], w1 [3,16], b1 [3]
    wf = jnp.dot(w0.T, w1.T)     # fused weight [64, 3] (one-time ~3K-FLOP cost)
    b1_2d = b1.reshape(1, OUT_F)

    inputs = (x, y, z, w)
    flats = [a.reshape(-1, IN_F) for a in inputs]
    sizes = [f.shape[0] for f in flats]
    offsets = [0]
    for s in sizes:
        offsets.append(offsets[-1] + s)
    xcat = jnp.concatenate(flats, axis=0)          # [M_total, 64]  (M_total = 81)
    m_total = xcat.shape[0]
    relu_start, relu_end = offsets[2], offsets[3]  # z occupies this row range

    out = pl.pallas_call(
        functools.partial(
            _fused_mlp_kernel, relu_start=relu_start, relu_end=relu_end
        ),
        out_shape=jax.ShapeDtypeStruct((m_total, OUT_F), xcat.dtype),
        # No grid / BlockSpecs: whole arrays become single VMEM blocks.
    )(xcat, wf, b1_2d)

    return tuple(
        out[off:off + s].reshape(a.shape[:-1] + (OUT_F,))
        for a, s, off in zip(inputs, sizes, offsets[:-1])
    )


def _reference(x, y, z, w, params):
    # Pure-JAX two-step reference mirroring the original module exactly.
    w0, w1, b1 = params

    def f(a, relu=False):
        o = a @ w0.T @ w1.T + b1
        return jnp.maximum(o, 0.0) if relu else o

    return f(x), f(y), f(z, relu=True), f(w)


if __name__ == "__main__":
    key = jax.random.PRNGKey(0)
    k0, k1, k2, kx, ky, kz, kw = jax.random.split(key, 7)

    # PyTorch stores Linear weight as [out, in].
    w0 = jax.random.normal(k0, (HID_F, IN_F), jnp.float32) * 0.1   # linear_0.weight
    w1 = jax.random.normal(k1, (OUT_F, HID_F), jnp.float32) * 0.1  # linear_1.weight
    b1 = jax.random.normal(k2, (OUT_F,), jnp.float32) * 0.1        # linear_1.bias
    params = (w0, w1, b1)

    # Small inputs mirroring the pnnx test's rank pattern (1D/2D/4D/5D).
    x = jax.random.normal(kx, (IN_F,), jnp.float32)
    y = jax.random.normal(ky, (8, IN_F), jnp.float32)
    z = jax.random.normal(kz, (1, 3, 8, IN_F), jnp.float32)
    w = jax.random.normal(kw, (1, 2, 3, 8, IN_F), jnp.float32)

    fwd = jax.jit(model_forward)
    outs = jax.block_until_ready(fwd(x, y, z, w, params))

    refs = _reference(x, y, z, w, params)
    for o, r in zip(outs, refs):
        assert o.shape == r.shape, (o.shape, r.shape)
        assert jnp.allclose(o, r, atol=1e-5, rtol=1e-5), float(jnp.abs(o - r).max())

    print("KERNEL_OK")
</pallas_src>

<mosaic_0001>
module attributes {stable_mosaic.version = 11 : i64} {
  func.func @_fused_mlp_kernel(%arg0: memref<81x64xf32, #tpu.memory_space<vmem>>, %arg1: memref<64x3xf32, #tpu.memory_space<vmem>>, %arg2: memref<1x3xf32, #tpu.memory_space<vmem>>, %arg3: memref<81x3xf32, #tpu.memory_space<vmem>>) attributes {dimension_semantics = [], scalar_prefetch = 0 : i64, scratch_operands = 0 : i64, tpu.core_type = #tpu.core_type<tc>} {
    %c0 = arith.constant 0 : index
    %c0_0 = arith.constant 0 : index
    %0 = vector.load %arg0[%c0, %c0_0] : memref<81x64xf32, #tpu.memory_space<vmem>>, vector<81x64xf32>
    %c0_1 = arith.constant 0 : index
    %c0_2 = arith.constant 0 : index
    %1 = vector.load %arg1[%c0_1, %c0_2] : memref<64x3xf32, #tpu.memory_space<vmem>>, vector<64x3xf32>
    %cst = arith.constant dense<0.000000e+00> : vector<81x3xf32>
    %2 = tpu.matmul %0, %1, %cst {dimension_numbers = #tpu.dot_dimension_numbers<[1], [0], [0], [1], [0, 0, 1, 1], [], []>} : vector<81x64xf32>, vector<64x3xf32>, vector<81x3xf32> -> vector<81x3xf32>
    %c0_3 = arith.constant 0 : index
    %c0_4 = arith.constant 0 : index
    %3 = vector.load %arg2[%c0_3, %c0_4] : memref<1x3xf32, #tpu.memory_space<vmem>>, vector<1x3xf32>
    %4 = vector.broadcast %3 : vector<1x3xf32> to vector<81x3xf32>
    %5 = arith.addf %2, %4 : vector<81x3xf32>
    %6 = tpu.iota {dimensions = array<i32: 0>} : vector<81x3xi32>
    %c9_i32 = arith.constant 9 : i32
    %7 = vector.broadcast %c9_i32 : i32 to vector<81x3xi32>
    %8 = arith.cmpi sge, %6, %7 : vector<81x3xi32>
    %c33_i32 = arith.constant 33 : i32
    %9 = vector.broadcast %c33_i32 : i32 to vector<81x3xi32>
    %10 = arith.cmpi slt, %6, %9 : vector<81x3xi32>
    %11 = arith.andi %8, %10 : vector<81x3xi1>
    %cst_5 = arith.constant 0.000000e+00 : f32
    %12 = vector.broadcast %cst_5 : f32 to vector<81x3xf32>
    %13 = arith.maximumf %5, %12 : vector<81x3xf32>
    %14 = arith.select %11, %13, %5 : vector<81x3xi1>, vector<81x3xf32>
    %c0_6 = arith.constant 0 : index
    %c0_7 = arith.constant 0 : index
    %15 = vector.load %arg3[%c0_6, %c0_7] : memref<81x3xf32, #tpu.memory_space<vmem>>, vector<81x3xf32>
    tpu.vector_store %arg3[%c0_6, %c0_7], %14 {strides = array<i32>} : memref<81x3xf32, #tpu.memory_space<vmem>>, vector<81x3xf32>,
    return
  }
}

</mosaic_0001>

<bundles_post_ra>
// kernel: model_forward.1
= control target key start
LH: loop header
LB: loop body
LE: loop exit
PB: predicated region body
PF: predicated region fallthrough
CT: control target
= control target key end

     0   :  { %v381_v0 = vmov 0.0|0.0   ;;  %vm382_vm0 = vmmov 0   ;;  %v383_v6 = vmov 0.0   ;;  %vm40_vm1 = vcmask 523264   ;;  %s529_s1 = inlined_call_operand.vmem [shape: f32[64,3], index: 1, kind: input, shape index: {}]   ;;  %s530_s0 = inlined_call_operand.vmem [shape: f32[81,64], index: 0, kind: input, shape index: {}]   ;;  %s531_s2 = inlined_call_operand.vmem [shape: f32[1,3], index: 2, kind: input, shape index: {}]   ;;  %s532_s3 = inlined_call_operand.vmem [shape: f32[81,3], index: 3, kind: output, shape index: {}]  }
   0x1   :  { %358 = vmatprep.subr.bf16.mxu0 %v381_v0  ;;  %v25_v1 = vld [vmem:[%s529_s1] sm:$0xff]  ;;  %v26_v2 = vld [vmem:[%s529_s1 + $0x8] sm:$0xff]  ;;  %370 = vmatprep.subr.bf16.mxu1 %v381_v0  ;;  %v27_v3 = vld [vmem:[%s529_s1 + $0x10] sm:$0xff]  ;;  %v194_v25 = vlaneseq  ;;  %vm261_vm2 = vcmask 23552   ;;  %vm272_vm4 = vcmask 16384  }
   0x2   :  { %v359_v4 = vpack.c.bf16 %v26_v2, %v25_v1  ;;  %v28_v5 = vld [vmem:[%s529_s1 + $0x18] sm:$0xff]  ;;  %325 = vmatprep.mubr.msk.f32.mxu0 %vm382_vm0, %v383_v6  ;;  %343 = vmatprep.mubr.msk.f32.mxu1 %vm382_vm0, %v383_v6  ;;  %v29_v8 = vld [vmem:[%s529_s1 + $0x20] sm:$0xff]  ;;  %v30_v9 = vld [vmem:[%s529_s1 + $0x28] sm:$0xff] }
   0x3   :  { %v362_v7 = vpack.c.bf16 %v28_v5, %v27_v3  ;;  %v365_v10 = vpack.c.bf16 %v30_v9, %v29_v8  ;;  %v31_v11 = vld [vmem:[%s529_s1 + $0x30] sm:$0xff]  ;;  %v32_v12 = vld [vmem:[%s529_s1 + $0x38] sm:$0xff]  ;;  %v14_v14 = vld [vmem:[%s530_s0] sm:$0xff]  ;;  %v195_v27 = vshrl.u32 %v194_v25, 7 }
   0x4   :  { %360 = vmatpush3.bf16.msra.mxu0 %v359_v4  ;;  %374 = vmatpush3.bf16.msra.mxu1 %v359_v4  ;;  %v368_v13 = vpack.c.bf16 %v32_v12, %v31_v11  ;;  %v20_v15 = vld [vmem:[%s530_s0 + $0x30] sm:$0xff]  ;;  %v15_v16 = vld [vmem:[%s530_s0 + $0x8] sm:$0xff]  ;;  %v21_v17 = vld [vmem:[%s530_s0 + $0x38] sm:$0xff] }
   0x5   :  { %361 = vmatprep.subr.bf16.mxu0 %v381_v0  ;;  %371 = vmatprep.subr.bf16.mxu1 %v381_v0  ;;  %v16_v18 = vld [vmem:[%s530_s0 + $0x10] sm:$0xff]  ;;  %v22_v19 = vld [vmem:[%s530_s0 + $0x40] sm:$0xff]  ;;  %v17_v20 = vld [vmem:[%s530_s0 + $0x18] sm:$0xff]  ;;  %v196_v34 = vadd.s32 8, %v195_v27  ;;  %v199_v56 = vadd.s32 32, %v195_v27 }
   0x6   :  { %v23_v21 = vld [vmem:[%s530_s0 + $0x48] sm:$0xff]  ;;  %v18_v22 = vld [vmem:[%s530_s0 + $0x20] sm:$0xff]  ;;  %v24_v23 = vld [vmem:[%s530_s0 + $0x50] sm:$0x1] }
   0x7   :  { %v19_v24 = vld [vmem:[%s530_s0 + $0x28] sm:$0xff]  ;;  %v278_v26 = vld [vmem:[%s531_s2] ss:$0 sm:$0xff]  ;;  %vm207_vm3 = vcmp.ge.s32.totalorder %v196_v34, 9  ;;  %vm221_vm5 = vcmp.lt.s32.totalorder %v199_v56, 33 }
   0x8   :  { %363 = vmatpush3.bf16.msra.mxu0 %v362_v7  ;;  %375 = vmatpush3.bf16.msra.mxu1 %v362_v7 }
   0x9   :  { %364 = vmatprep.subr.bf16.mxu0 %v381_v0  ;;  %372 = vmatprep.subr.bf16.mxu1 %v381_v0 }
   0xc   :  { %366 = vmatpush3.bf16.msra.mxu0 %v365_v10  ;;  %376 = vmatpush3.bf16.msra.mxu1 %v365_v10 }
   0xd   :  { %367 = vmatprep.subr.bf16.mxu0 %v381_v0  ;;  %373 = vmatprep.subr.bf16.mxu1 %v381_v0 }
  0x10   :  { %369 = vmatpush3.bf16.msra.mxu0 %v368_v13  ;;  %377 = vmatpush3.bf16.msra.mxu1 %v368_v13 }
  0x13   :  { %326 = vmatmul.mubr.msk.f32.vlgmr.msra.gmra.mrb[0].mxu0 %vm40_vm1, %v14_v14  ;;  %344 = vmatmul.mubr.msk.f32.vlgmr.msra.gmra.mrb[0].mxu1 %vm40_vm1, %v20_v15 }
  0x14   :  { %328 = vmatprep.mubr.msk.f32.mxu0 %vm382_vm0, %v383_v6  ;;  %346 = vmatprep.mubr.msk.f32.mxu1 %vm382_vm0, %v383_v6 }
  0x17   :  { %329 = vmatmul.mubr.msk.f32.gmra.mrb[2].mxu0 %vm40_vm1, %v15_v16  ;;  %347 = vmatmul.mubr.msk.f32.gmra.mrb[2].mxu1 %vm40_vm1, %v21_v17 }
  0x18   :  { %331 = vmatprep.mubr.msk.f32.mxu0 %vm382_vm0, %v383_v6  ;;  %349 = vmatprep.mubr.msk.f32.mxu1 %vm382_vm0, %v383_v6 }
  0x1b   :  { %332 = vmatmul.mubr.msk.f32.gmra.mrb[4].mxu0 %vm40_vm1, %v16_v18  ;;  %350 = vmatmul.mubr.msk.f32.gmra.mrb[4].mxu1 %vm40_vm1, %v22_v19 }
  0x1c   :  { %334 = vmatprep.mubr.msk.f32.mxu0 %vm382_vm0, %v383_v6  ;;  %352 = vmatprep.mubr.msk.f32.mxu1 %vm382_vm0, %v383_v6 }
  0x1f   :  { %335 = vmatmul.mubr.msk.f32.gmra.mrb[6].mxu0 %vm40_vm1, %v17_v20  ;;  %353 = vmatmul.mubr.msk.f32.gmra.mrb[6].mxu1 %vm40_vm1, %v23_v21 }
  0x20   :  { %337 = vmatprep.mubr.msk.f32.mxu0 %vm382_vm0, %v383_v6  ;;  %355 = vmatprep.mubr.msk.f32.mxu1 %vm382_vm0, %v383_v6 }
  0x23   :  { %338 = vmatmul.mubr.msk.f32.gmra.mrb[8].mxu0 %vm40_vm1, %v18_v22  ;;  %356 = vmatmul.mubr.msk.f32.gmra.mrb[8].mxu1 %vm40_vm1, %v24_v23 }
  0x24   :  { %340 = vmatprep.mubr.msk.f32.mxu0 %vm382_vm0, %v383_v6 }
  0x27   :  { %341 = vmatmul.mubr.msk.f32.gmra.mrb[10].mxu0 %vm40_vm1, %v19_v24 }
  0xe6   :  { %v140_v28 = vpop.f32.mrb[0].mxu0  ;;  %v170_v29 = vpop.f32.mrb[0].mxu1 }
  0xe7   :  { %v141_v30 = vadd.f32 %v278_v26, %v140_v28  ;;  %v327_v31 = vpop.f32.mrb[1].mxu0  ;;  %v171_v32 = vadd.f32 %v278_v26, %v170_v29  ;;  %v345_v33 = vpop.f32.mrb[1].mxu1 }
  0xe9   :  { %262 = vst.msk [vmem:[%s532_s3] sm:$0xff] %vm261_vm2, %v141_v30  ;;  %268 = vst.msk [vmem:[%s532_s3 + $0x30] sm:$0xff] %vm261_vm2, %v171_v32 }
  0xea   :  { %v145_v35 = vpop.f32.mrb[2].mxu0  ;;  %v175_v36 = vpop.f32.mrb[2].mxu1 }
  0xeb   :  { %v146_v37 = vadd.f32 %v278_v26, %v145_v35  ;;  %v330_v38 = vpop.f32.mrb[3].mxu0  ;;  %v176_v39 = vadd.f32 %v278_v26, %v175_v36  ;;  %v348_v40 = vpop.f32.mrb[3].mxu1 }
  0xed   :  { %v240_v41 = vmax.f32 %v146_v37, 0.0  ;;  %269 = vst.msk [vmem:[%s532_s3 + $0x38] sm:$0xff] %vm261_vm2, %v176_v39 }
  0xee   :  { %v150_v42 = vpop.f32.mrb[4].mxu0  ;;  %v180_v43 = vpop.f32.mrb[4].mxu1 }
  0xef   :  { %v251_v44 = vsel %vm207_vm3, %v240_v41, %v146_v37  ;;  %v151_v45 = vadd.f32 %v278_v26, %v150_v42  ;;  %v333_v46 = vpop.f32.mrb[5].mxu0  ;;  %v181_v47 = vadd.f32 %v278_v26, %v180_v43  ;;  %v351_v48 = vpop.f32.mrb[5].mxu1 }
  0xf0   :  { %263 = vst.msk [vmem:[%s532_s3 + $0x8] sm:$0xff] %vm261_vm2, %v251_v44 }
  0xf1   :  { %v241_v49 = vmax.f32 %v151_v45, 0.0  ;;  %270 = vst.msk [vmem:[%s532_s3 + $0x40] sm:$0xff] %vm261_vm2, %v181_v47 }
  0xf2   :  { %v155_v50 = vpop.f32.mrb[6].mxu0  ;;  %v185_v51 = vpop.f32.mrb[6].mxu1 }
  0xf3   :  { %264 = vst.msk [vmem:[%s532_s3 + $0x10] sm:$0xff] %vm261_vm2, %v241_v49  ;;  %v156_v52 = vadd.f32 %v278_v26, %v155_v50  ;;  %v336_v53 = vpop.f32.mrb[7].mxu0  ;;  %v186_v54 = vadd.f32 %v278_v26, %v185_v51  ;;  %v354_v55 = vpop.f32.mrb[7].mxu1 }
  0xf5   :  { %v242_v57 = vmax.f32 %v156_v52, 0.0  ;;  %271 = vst.msk [vmem:[%s532_s3 + $0x48] sm:$0xff] %vm261_vm2, %v186_v54 }
  0xf6   :  { %v160_v58 = vpop.f32.mrb[8].mxu0  ;;  %v190_v59 = vpop.f32.mrb[8].mxu1 }
  0xf7   :  { %265 = vst.msk [vmem:[%s532_s3 + $0x18] sm:$0xff] %vm261_vm2, %v242_v57  ;;  %v161_v60 = vadd.f32 %v278_v26, %v160_v58  ;;  %v339_v61 = vpop.f32.mrb[9].mxu0  ;;  %v191_v62 = vadd.f32 %v278_v26, %v190_v59  ;;  %v357_v63 = vpop.f32.mrb[9].mxu1 }
  0xf9   :  { %v243_v0 = vmax.f32 %v161_v60, 0.0  ;;  %273 = vst.msk [vmem:[%s532_s3 + $0x50] sm:$0x1] %vm272_vm4, %v191_v62 }
  0xfa   :  { %v165_v1 = vpop.f32.mrb[10].mxu0 }
  0xfb   :  { %v254_v2 = vsel %vm221_vm5, %v243_v0, %v161_v60  ;;  %v166_v3 = vadd.f32 %v278_v26, %v165_v1  ;;  %v342_v4 = vpop.f32.mrb[11].mxu0 }
  0xfc   :  { %266 = vst.msk [vmem:[%s532_s3 + $0x20] sm:$0xff] %vm261_vm2, %v254_v2 }
  0xfd   :  { %267 = vst.msk [vmem:[%s532_s3 + $0x28] sm:$0xff] %vm261_vm2, %v166_v3 }

</bundles_post_ra>
